<compile_context>
chip_gen: v7x
topology: tpu7x:2x2x1
jax: 0.10.0
libtpu: 0.0.40
codegen_flags: <defaults>
</compile_context>

<pallas_src>
import jax
import jax.numpy as jnp
import numpy as np
from jax import lax
from jax.experimental import pallas as pl
from jax.experimental.pallas import tpu as pltpu


def _round_up(n, m):
    return ((n + m - 1) // m) * m


def _pick_batch_tile(batch):
    """Batch tile: big tiles for the 256-wide v6e/v7x MXUs (128 on v5e), and >= 2 grid
    steps where possible so dimension_semantics=('parallel',) can shard v7x's 2 TCs."""
    b8 = _round_up(batch, 8)
    try:
        kind = jax.devices()[0].device_kind.lower()
    except Exception:  # backend not initialised / unknown
        kind = ""
    cap = 128 if "v5" in kind else 512
    tb = min(cap, b8)
    if b8 > 8 and _round_up(batch, tb) // tb < 2:
        tb = _round_up((b8 + 1) // 2, 8)
    return tb


def _actor_critic_kernel(x_ref, tid_ref, coltask_ref, slab_ref, bias_ref, csum_ref,
                         g_ref, out_ref):
    TB = x_ref.shape[0]
    A = g_ref.shape[1]            # action_dim
    CW = csum_ref.shape[1]        # lane-dense compacted width (>= A+1, multiple of 128)

    # ---- all-task actor+critic affine: one bf16 MXU matmul + resident bias row ----
    x = x_ref[...].astype(jnp.bfloat16)                                   # VPU cast, HBM stays f32
    z_all = jnp.dot(x, slab_ref[...], preferred_element_type=jnp.float32)  # (TB, T*(A+1))
    z_all = z_all + bias_ref[...]                                         # broadcast bias row

    # Per-row task selection on the VPU (NaN-safe select) + column-group compaction matmul.
    match = coltask_ref[...] == tid_ref[...]                              # (TB, T*(A+1)) bool
    masked = jnp.where(match, z_all, 0.0)
    zv = jnp.dot(masked, csum_ref[...], preferred_element_type=jnp.float32)  # (TB, CW)
    # zv lanes: [0:A] actor logits, [A] critic value, [A+1:] zeros.

    lane = lax.broadcasted_iota(jnp.int32, (TB, CW), 1)
    is_act = lane < A
    NEG = jnp.float32(-1e30)

    # ---- stable log-softmax / probs / entropy over the action lanes (in vregs) ----
    logits = jnp.where(is_act, zv, NEG)
    m = jnp.max(logits, axis=-1, keepdims=True)
    zc = logits - m
    ez = jnp.exp(zc)                                   # masked lanes underflow to exactly 0
    sum_ez = jnp.sum(ez, axis=-1, keepdims=True)
    log_sum = jnp.log(sum_ez)
    inv = pl.reciprocal(sum_ez, approx=True)           # EUP slot; frees VALU issue slots
    p = ez * inv
    logp = zc - log_sum
    ent = -jnp.sum(jnp.where(is_act, p * logp, 0.0), axis=-1, keepdims=True)   # (TB, 1)

    # ---- Categorical(logits).sample() via Gumbel-max (noise streamed from wrapper) ----
    act_iota = lax.broadcasted_iota(jnp.int32, (TB, A), 1)
    noisy = zv[:, :A] + g_ref[...]
    mx = jnp.max(noisy, axis=-1, keepdims=True)
    a = jnp.min(jnp.where(noisy >= mx, act_iota, jnp.int32(A)),
                axis=-1, keepdims=True)                                  # (TB, 1) int32

    logp_a = jnp.sum(jnp.where(lane == a, logp, 0.0), axis=-1, keepdims=True)  # (TB, 1)
    v = jnp.sum(jnp.where(lane == A, zv, 0.0), axis=-1, keepdims=True)         # (TB, 1)

    # ---- single lane-dense output slab: lanes [a, log_pi_a, ent, v, 0, ...] ----
    a_f = a.astype(jnp.float32)   # exact for action_dim < 2^24; wrapper casts back to int32
    packed = (jnp.where(lane == 0, a_f, 0.0)
              + jnp.where(lane == 1, logp_a, 0.0)
              + jnp.where(lane == 2, ent, 0.0)
              + jnp.where(lane == 3, v, 0.0))
    out_ref[...] = packed


def categorical_actor_critic_forward(obs, task_id, actor_w, actor_b, critic_w, critic_b, key):
    """obs: (B, D) f32; task_id: (B,) int; actor_w: (T, D, A); actor_b: (T, A);
    critic_w: (T, D, 1); critic_b: (T, 1).
    Returns {'a': (B,) int32, 'log_pi_a': (B, 1), 'ent': (B, 1), 'v': (B, 1)}."""
    B, D = obs.shape
    T, D2, A = actor_w.shape
    assert D == D2 and critic_w.shape == (T, D, 1)
    A1 = A + 1
    CW = _round_up(A1, 128)      # lane-dense compaction / output width

    # Pack [actor W | critic W] of ALL tasks into one lane-dense bf16 slab (D, T*(A+1));
    # biases stay f32 as a resident row added on the VPU after the matmul (no ones-column,
    # so the streamed obs keep their native layout - no HBM rewrite of obs).
    # TODO(synk): for large task tables, switch to MoE-style grouping: sort rows by task,
    # PrefetchScalarGridSpec with group offsets, and a weight index_map selecting only the
    # needed (D, A+1) slice (makes FLOPs and resident VMEM O(1) in T).
    w_cat = jnp.concatenate([actor_w, critic_w], axis=2)                 # (T, D, A+1)
    slab = jnp.transpose(w_cat, (1, 0, 2)).reshape(D, T * A1).astype(jnp.bfloat16)
    b_cat = jnp.concatenate([actor_b, critic_b], axis=1)                 # (T, A+1)
    bias_row = b_cat.reshape(1, T * A1).astype(jnp.float32)

    # Constants: column -> task map, and column-group compaction matrix (padded to CW lanes;
    # the MXU pads N to 128 internally anyway, so the padding is free).
    col = np.arange(T * A1)
    col_task = jnp.asarray(col // A1, jnp.int32)[None, :]                # (1, T*A1)
    csum_np = np.zeros((T * A1, CW), np.float32)
    csum_np[col, col % A1] = 1.0
    csum = jnp.asarray(csum_np)                                          # (T*A1, CW)

    TB = _pick_batch_tile(B)
    B_pad = _round_up(B, TB)
    pad = B_pad - B

    x = obs.astype(jnp.float32)
    tid = task_id.astype(jnp.int32)
    if pad:
        # Padded rows get task 0 / zero features on purpose; they are sliced off below.
        x = jnp.concatenate([x, jnp.zeros((pad, D), jnp.float32)], axis=0)
        tid = jnp.concatenate([tid, jnp.zeros((pad,), jnp.int32)], axis=0)
    tid = tid.reshape(B_pad, 1)

    # TODO(synk): generate Gumbel noise in-kernel (pltpu.prng_seed / prng_random_bits) to
    # drop this HBM stream; kept in the wrapper so interpret/CPU tests also run.
    gumbel = jax.random.gumbel(key, (B_pad, A), jnp.float32)

    def run(single_buffer_resident):
        res_kw = {}
        if single_buffer_resident and hasattr(pl, "Buffered"):
            # Resident operands: block index never changes -> no need to double-buffer.
            res_kw["pipeline_mode"] = pl.Buffered(1)
        vmem_est = (2 * (TB * D * 4 + TB * 4 + TB * A * 4 + TB * CW * 4)     # streamed, x2 buf
                    + D * T * A1 * 2 + 2 * T * A1 * 4 + T * A1 * CW * 4)     # resident
        vmem_limit = int(min(64 * 2 ** 20, max(32 * 2 ** 20, 2 * vmem_est)))
        return pl.pallas_call(
            _actor_critic_kernel,
            grid=(B_pad // TB,),
            in_specs=[
                pl.BlockSpec((TB, D), lambda i: (i, 0)),                  # obs (streamed)
                pl.BlockSpec((TB, 1), lambda i: (i, 0)),                  # task ids (streamed)
                pl.BlockSpec((1, T * A1), lambda i: (0, 0), **res_kw),    # column -> task map
                pl.BlockSpec((D, T * A1), lambda i: (0, 0), **res_kw),    # bf16 weight slab
                pl.BlockSpec((1, T * A1), lambda i: (0, 0), **res_kw),    # bias row
                pl.BlockSpec((T * A1, CW), lambda i: (0, 0), **res_kw),   # compaction matrix
                pl.BlockSpec((TB, A), lambda i: (i, 0)),                  # gumbel noise (streamed)
            ],
            out_specs=pl.BlockSpec((TB, CW), lambda i: (i, 0)),           # lane-dense output slab
            out_shape=jax.ShapeDtypeStruct((B_pad, CW), jnp.float32),
            compiler_params=pltpu.CompilerParams(
                dimension_semantics=("parallel",),
                vmem_limit_bytes=vmem_limit),
        )(x, tid, col_task, slab, bias_row, csum, gumbel)

    try:
        packed = run(True)
    except Exception:
        # Fallback for jax versions without BlockSpec pipeline_mode / Buffered(1) support.
        packed = run(False)

    # TODO(synk): PyTorch returns int64 actions; int32 emitted here (JAX x64 off by default).
    a = packed[:B, 0].astype(jnp.int32)
    log_pi_a = packed[:B, 1:2]
    ent = packed[:B, 2:3]
    v = packed[:B, 3:4]
    return {"a": a, "log_pi_a": log_pi_a, "ent": ent, "v": v}


if __name__ == "__main__":
    key = jax.random.PRNGKey(0)
    B, state_dim, action_dim, n_tasks = 4, 16, 6, 3
    k_obs, k_tid, k_wa, k_wc, k_sample = jax.random.split(key, 5)

    obs = jax.random.normal(k_obs, (B, state_dim), jnp.float32)
    task_id = jax.random.randint(k_tid, (B,), 0, n_tasks, jnp.int32)

    # MultiLinear init: weights scaled by w_scale=0.001, zero biases.
    actor_w = 0.001 * jax.random.normal(k_wa, (n_tasks, state_dim, action_dim), jnp.float32)
    actor_b = jnp.zeros((n_tasks, action_dim), jnp.float32)
    critic_w = 0.001 * jax.random.normal(k_wc, (n_tasks, state_dim, 1), jnp.float32)
    critic_b = jnp.zeros((n_tasks, 1), jnp.float32)

    out = categorical_actor_critic_forward(obs, task_id, actor_w, actor_b,
                                           critic_w, critic_b, k_sample)
    jax.block_until_ready(out)

    a, log_pi_a, ent, v = out["a"], out["log_pi_a"], out["ent"], out["v"]
    assert a.shape == (B,) and a.dtype == jnp.int32
    assert log_pi_a.shape == (B, 1) and ent.shape == (B, 1) and v.shape == (B, 1)
    assert bool(jnp.all((a >= 0) & (a < action_dim)))

    # Pure-JAX f32 reference for the deterministic parts (logits / value / log-prob / entropy).
    wa, ba = actor_w[task_id], actor_b[task_id]
    wc, bc = critic_w[task_id], critic_b[task_id]
    logits_ref = jnp.einsum("bd,bda->ba", obs, wa) + ba
    v_ref = jnp.einsum("bd,bda->ba", obs, wc) + bc
    logp_ref = jax.nn.log_softmax(logits_ref, axis=-1)
    ent_ref = -jnp.sum(jnp.exp(logp_ref) * logp_ref, axis=-1, keepdims=True)
    logp_a_ref = jnp.take_along_axis(logp_ref, a[:, None].astype(jnp.int32), axis=-1)

    # bf16 MXU slab + approx-reciprocal softmax => slightly relaxed tolerances.
    assert bool(jnp.allclose(v, v_ref, atol=1e-3))
    assert bool(jnp.allclose(log_pi_a, logp_a_ref, atol=2e-3))
    assert bool(jnp.allclose(ent, ent_ref, atol=2e-2))
    print("KERNEL_OK")
</pallas_src>

<mosaic_0001>
module attributes {stable_mosaic.version = 11 : i64} {
  func.func @_actor_critic_kernel(%arg0: i32, %arg1: memref<8x16xf32, #tpu.memory_space<vmem>>, %arg2: memref<8x1xi32, #tpu.memory_space<vmem>>, %arg3: memref<1x21xi32, #tpu.memory_space<vmem>>, %arg4: memref<16x21xbf16, #tpu.memory_space<vmem>>, %arg5: memref<1x21xf32, #tpu.memory_space<vmem>>, %arg6: memref<21x128xf32, #tpu.memory_space<vmem>>, %arg7: memref<8x6xf32, #tpu.memory_space<vmem>>, %arg8: memref<8x128xf32, #tpu.memory_space<vmem>>) attributes {dimension_semantics = [#tpu.dimension_semantics<parallel>], iteration_bounds = array<i64: 1>, scalar_prefetch = 0 : i64, scratch_operands = 0 : i64, tpu.core_type = #tpu.core_type<tc>, window_params = [{transform_indices = @transform_0, window_bounds = array<i64: 8, 16>}, {transform_indices = @transform_1, window_bounds = array<i64: 8, 1>}, {pipeline_mode = #tpu.pipeline_mode<synchronous>, transform_indices = @transform_2, window_bounds = array<i64: 1, 21>}, {pipeline_mode = #tpu.pipeline_mode<synchronous>, transform_indices = @transform_3, window_bounds = array<i64: 16, 21>}, {pipeline_mode = #tpu.pipeline_mode<synchronous>, transform_indices = @transform_4, window_bounds = array<i64: 1, 21>}, {pipeline_mode = #tpu.pipeline_mode<synchronous>, transform_indices = @transform_5, window_bounds = array<i64: 21, 128>}, {transform_indices = @transform_6, window_bounds = array<i64: 8, 6>}, {transform_indices = @transform_7, window_bounds = array<i64: 8, 128>}]} {
    %c0 = arith.constant 0 : index
    %c0_0 = arith.constant 0 : index
    %0 = vector.load %arg1[%c0, %c0_0] : memref<8x16xf32, #tpu.memory_space<vmem>>, vector<8x16xf32>
    %1 = arith.truncf %0 : vector<8x16xf32> to vector<8x16xbf16>
    %c0_1 = arith.constant 0 : index
    %c0_2 = arith.constant 0 : index
    %2 = vector.load %arg4[%c0_1, %c0_2] : memref<16x21xbf16, #tpu.memory_space<vmem>>, vector<16x21xbf16>
    %cst = arith.constant dense<0.000000e+00> : vector<8x21xf32>
    %3 = tpu.matmul %1, %2, %cst {dimension_numbers = #tpu.dot_dimension_numbers<[1], [0], [0], [1], [0, 0, 1, 1], [], []>} : vector<8x16xbf16>, vector<16x21xbf16>, vector<8x21xf32> -> vector<8x21xf32>
    %c0_3 = arith.constant 0 : index
    %c0_4 = arith.constant 0 : index
    %4 = vector.load %arg5[%c0_3, %c0_4] : memref<1x21xf32, #tpu.memory_space<vmem>>, vector<1x21xf32>
    %5 = vector.broadcast %4 : vector<1x21xf32> to vector<8x21xf32>
    %6 = arith.addf %3, %5 : vector<8x21xf32>
    %c0_5 = arith.constant 0 : index
    %c0_6 = arith.constant 0 : index
    %7 = vector.load %arg3[%c0_5, %c0_6] : memref<1x21xi32, #tpu.memory_space<vmem>>, vector<1x21xi32>
    %c0_7 = arith.constant 0 : index
    %c0_8 = arith.constant 0 : index
    %8 = vector.load %arg2[%c0_7, %c0_8] : memref<8x1xi32, #tpu.memory_space<vmem>>, vector<8x1xi32>
    %9 = vector.broadcast %7 : vector<1x21xi32> to vector<8x21xi32>
    %10 = vector.broadcast %8 : vector<8x1xi32> to vector<8x21xi32>
    %11 = arith.cmpi eq, %9, %10 : vector<8x21xi32>
    %cst_9 = arith.constant 0.000000e+00 : f32
    %12 = vector.broadcast %cst_9 : f32 to vector<8x21xf32>
    %13 = arith.select %11, %6, %12 : vector<8x21xi1>, vector<8x21xf32>
    %c0_10 = arith.constant 0 : index
    %c0_11 = arith.constant 0 : index
    %14 = vector.load %arg6[%c0_10, %c0_11] : memref<21x128xf32, #tpu.memory_space<vmem>>, vector<21x128xf32>
    %cst_12 = arith.constant dense<0.000000e+00> : vector<8x128xf32>
    %15 = tpu.matmul %13, %14, %cst_12 {dimension_numbers = #tpu.dot_dimension_numbers<[1], [0], [0], [1], [0, 0, 1, 1], [], []>} : vector<8x21xf32>, vector<21x128xf32>, vector<8x128xf32> -> vector<8x128xf32>
    %16 = tpu.iota {dimensions = array<i32: 1>} : vector<8x128xi32>
    %c6_i32 = arith.constant 6 : i32
    %17 = vector.broadcast %c6_i32 : i32 to vector<8x128xi32>
    %18 = arith.cmpi slt, %16, %17 : vector<8x128xi32>
    %cst_13 = arith.constant -1.000000e+30 : f32
    %19 = vector.broadcast %cst_13 : f32 to vector<8x128xf32>
    %20 = arith.select %18, %15, %19 : vector<8x128xi1>, vector<8x128xf32>
    %cst_14 = arith.constant dense<0xFF800000> : vector<8xf32>
    %21 = vector.multi_reduction <maximumf>, %20, %cst_14 [1] : vector<8x128xf32> to vector<8xf32>
    %22 = vector.shape_cast %21 : vector<8xf32> to vector<8x1xf32>
    %23 = vector.broadcast %22 : vector<8x1xf32> to vector<8x128xf32>
    %24 = arith.subf %20, %23 : vector<8x128xf32>
    %25 = math.exp %24 : vector<8x128xf32>
    %cst_15 = arith.constant dense<0.000000e+00> : vector<8xf32>
    %26 = vector.multi_reduction <add>, %25, %cst_15 [1] : vector<8x128xf32> to vector<8xf32>
    %27 = vector.shape_cast %26 : vector<8xf32> to vector<8x1xf32>
    %28 = math.log %27 : vector<8x1xf32>
    %29 = tpu.reciprocal %27 {approx = true} : vector<8x1xf32> -> vector<8x1xf32>
    %30 = vector.broadcast %29 : vector<8x1xf32> to vector<8x128xf32>
    %31 = arith.mulf %25, %30 : vector<8x128xf32>
    %32 = vector.broadcast %28 : vector<8x1xf32> to vector<8x128xf32>
    %33 = arith.subf %24, %32 : vector<8x128xf32>
    %34 = arith.mulf %31, %33 : vector<8x128xf32>
    %cst_16 = arith.constant 0.000000e+00 : f32
    %35 = vector.broadcast %cst_16 : f32 to vector<8x128xf32>
    %36 = arith.select %18, %34, %35 : vector<8x128xi1>, vector<8x128xf32>
    %cst_17 = arith.constant dense<0.000000e+00> : vector<8xf32>
    %37 = vector.multi_reduction <add>, %36, %cst_17 [1] : vector<8x128xf32> to vector<8xf32>
    %38 = vector.shape_cast %37 : vector<8xf32> to vector<8x1xf32>
    %cst_18 = arith.constant 0.000000e+00 : f32
    %39 = vector.broadcast %cst_18 : f32 to vector<8x1xf32>
    %40 = arith.subf %39, %38 : vector<8x1xf32>
    %41 = tpu.iota {dimensions = array<i32: 1>} : vector<8x6xi32>
    %42 = vector.extract_strided_slice %15 {offsets = [0, 0], sizes = [8, 6], strides = [1, 1]} : vector<8x128xf32> to vector<8x6xf32>
    %c0_19 = arith.constant 0 : index
    %c0_20 = arith.constant 0 : index
    %43 = vector.load %arg7[%c0_19, %c0_20] : memref<8x6xf32, #tpu.memory_space<vmem>>, vector<8x6xf32>
    %44 = arith.addf %42, %43 : vector<8x6xf32>
    %cst_21 = arith.constant dense<0xFF800000> : vector<8xf32>
    %45 = vector.multi_reduction <maximumf>, %44, %cst_21 [1] : vector<8x6xf32> to vector<8xf32>
    %46 = vector.shape_cast %45 : vector<8xf32> to vector<8x1xf32>
    %47 = vector.broadcast %46 : vector<8x1xf32> to vector<8x6xf32>
    %48 = arith.cmpf oge, %44, %47 : vector<8x6xf32>
    %c6_i32_22 = arith.constant 6 : i32
    %49 = vector.broadcast %c6_i32_22 : i32 to vector<8x6xi32>
    %50 = arith.select %48, %41, %49 : vector<8x6xi1>, vector<8x6xi32>
    %cst_23 = arith.constant dense<2147483647> : vector<8xi32>
    %51 = vector.multi_reduction <minsi>, %50, %cst_23 [1] : vector<8x6xi32> to vector<8xi32>
    %52 = vector.shape_cast %51 : vector<8xi32> to vector<8x1xi32>
    %53 = vector.broadcast %52 : vector<8x1xi32> to vector<8x128xi32>
    %54 = arith.cmpi eq, %16, %53 : vector<8x128xi32>
    %cst_24 = arith.constant 0.000000e+00 : f32
    %55 = vector.broadcast %cst_24 : f32 to vector<8x128xf32>
    %56 = arith.select %54, %33, %55 : vector<8x128xi1>, vector<8x128xf32>
    %cst_25 = arith.constant dense<0.000000e+00> : vector<8xf32>
    %57 = vector.multi_reduction <add>, %56, %cst_25 [1] : vector<8x128xf32> to vector<8xf32>
    %58 = vector.shape_cast %57 : vector<8xf32> to vector<8x1xf32>
    %c6_i32_26 = arith.constant 6 : i32
    %59 = vector.broadcast %c6_i32_26 : i32 to vector<8x128xi32>
    %60 = arith.cmpi eq, %16, %59 : vector<8x128xi32>
    %cst_27 = arith.constant 0.000000e+00 : f32
    %61 = vector.broadcast %cst_27 : f32 to vector<8x128xf32>
    %62 = arith.select %60, %15, %61 : vector<8x128xi1>, vector<8x128xf32>
    %cst_28 = arith.constant dense<0.000000e+00> : vector<8xf32>
    %63 = vector.multi_reduction <add>, %62, %cst_28 [1] : vector<8x128xf32> to vector<8xf32>
    %64 = vector.shape_cast %63 : vector<8xf32> to vector<8x1xf32>
    %65 = arith.sitofp %52 : vector<8x1xi32> to vector<8x1xf32>
    %c0_i32 = arith.constant 0 : i32
    %66 = vector.broadcast %c0_i32 : i32 to vector<8x128xi32>
    %67 = arith.cmpi eq, %16, %66 : vector<8x128xi32>
    %cst_29 = arith.constant 0.000000e+00 : f32
    %68 = vector.shape_cast %65 : vector<8x1xf32> to vector<8x1xf32>
    %69 = vector.broadcast %68 : vector<8x1xf32> to vector<8x128xf32>
    %70 = vector.broadcast %cst_29 : f32 to vector<8x128xf32>
    %71 = arith.select %67, %69, %70 : vector<8x128xi1>, vector<8x128xf32>
    %c1_i32 = arith.constant 1 : i32
    %72 = vector.broadcast %c1_i32 : i32 to vector<8x128xi32>
    %73 = arith.cmpi eq, %16, %72 : vector<8x128xi32>
    %cst_30 = arith.constant 0.000000e+00 : f32
    %74 = vector.shape_cast %58 : vector<8x1xf32> to vector<8x1xf32>
    %75 = vector.broadcast %74 : vector<8x1xf32> to vector<8x128xf32>
    %76 = vector.broadcast %cst_30 : f32 to vector<8x128xf32>
    %77 = arith.select %73, %75, %76 : vector<8x128xi1>, vector<8x128xf32>
    %78 = arith.addf %71, %77 : vector<8x128xf32>
    %c2_i32 = arith.constant 2 : i32
    %79 = vector.broadcast %c2_i32 : i32 to vector<8x128xi32>
    %80 = arith.cmpi eq, %16, %79 : vector<8x128xi32>
    %cst_31 = arith.constant 0.000000e+00 : f32
    %81 = vector.shape_cast %40 : vector<8x1xf32> to vector<8x1xf32>
    %82 = vector.broadcast %81 : vector<8x1xf32> to vector<8x128xf32>
    %83 = vector.broadcast %cst_31 : f32 to vector<8x128xf32>
    %84 = arith.select %80, %82, %83 : vector<8x128xi1>, vector<8x128xf32>
    %85 = arith.addf %78, %84 : vector<8x128xf32>
    %c3_i32 = arith.constant 3 : i32
    %86 = vector.broadcast %c3_i32 : i32 to vector<8x128xi32>
    %87 = arith.cmpi eq, %16, %86 : vector<8x128xi32>
    %cst_32 = arith.constant 0.000000e+00 : f32
    %88 = vector.shape_cast %64 : vector<8x1xf32> to vector<8x1xf32>
    %89 = vector.broadcast %88 : vector<8x1xf32> to vector<8x128xf32>
    %90 = vector.broadcast %cst_32 : f32 to vector<8x128xf32>
    %91 = arith.select %87, %89, %90 : vector<8x128xi1>, vector<8x128xf32>
    %92 = arith.addf %85, %91 : vector<8x128xf32>
    %c0_33 = arith.constant 0 : index
    %c0_34 = arith.constant 0 : index
    %93 = vector.load %arg8[%c0_33, %c0_34] : memref<8x128xf32, #tpu.memory_space<vmem>>, vector<8x128xf32>
    tpu.vector_store %arg8[%c0_33, %c0_34], %92 {strides = array<i32>} : memref<8x128xf32, #tpu.memory_space<vmem>>, vector<8x128xf32>,
    return
  }
  func.func @transform_0(%arg0: i32) -> (i32, i32) {
    %c0_i32 = arith.constant 0 : i32
    %c0_i32_0 = arith.constant 0 : i32
    return %arg0, %c0_i32 : i32, i32
  }
  func.func @transform_1(%arg0: i32) -> (i32, i32) {
    %c0_i32 = arith.constant 0 : i32
    %c0_i32_0 = arith.constant 0 : i32
    return %arg0, %c0_i32 : i32, i32
  }
  func.func @transform_2(%arg0: i32) -> (i32, i32) {
    %c0_i32 = arith.constant 0 : i32
    %c0_i32_0 = arith.constant 0 : i32
    %c0_i32_1 = arith.constant 0 : i32
    return %c0_i32, %c0_i32_0 : i32, i32
  }
  func.func @transform_3(%arg0: i32) -> (i32, i32) {
    %c0_i32 = arith.constant 0 : i32
    %c0_i32_0 = arith.constant 0 : i32
    %c0_i32_1 = arith.constant 0 : i32
    return %c0_i32, %c0_i32_0 : i32, i32
  }
  func.func @transform_4(%arg0: i32) -> (i32, i32) {
    %c0_i32 = arith.constant 0 : i32
    %c0_i32_0 = arith.constant 0 : i32
    %c0_i32_1 = arith.constant 0 : i32
    return %c0_i32, %c0_i32_0 : i32, i32
  }
  func.func @transform_5(%arg0: i32) -> (i32, i32) {
    %c0_i32 = arith.constant 0 : i32
    %c0_i32_0 = arith.constant 0 : i32
    %c0_i32_1 = arith.constant 0 : i32
    return %c0_i32, %c0_i32_0 : i32, i32
  }
  func.func @transform_6(%arg0: i32) -> (i32, i32) {
    %c0_i32 = arith.constant 0 : i32
    %c0_i32_0 = arith.constant 0 : i32
    return %arg0, %c0_i32 : i32, i32
  }
  func.func @transform_7(%arg0: i32) -> (i32, i32) {
    %c0_i32 = arith.constant 0 : i32
    %c0_i32_0 = arith.constant 0 : i32
    return %arg0, %c0_i32 : i32, i32
  }
}

module attributes {stable_mosaic.version = 11 : i64} {
  func.func @_actor_critic_kernel(%arg0: i32, %arg1: memref<8x16xf32, #tpu.memory_space<vmem>>, %arg2: memref<8x1xi32, #tpu.memory_space<vmem>>, %arg3: memref<1x21xi32, #tpu.memory_space<vmem>>, %arg4: memref<16x21xbf16, #tpu.memory_space<vmem>>, %arg5: memref<1x21xf32, #tpu.memory_space<vmem>>, %arg6: memref<21x128xf32, #tpu.memory_space<vmem>>, %arg7: memref<8x6xf32, #tpu.memory_space<vmem>>, %arg8: memref<8x128xf32, #tpu.memory_space<vmem>>) attributes {dimension_semantics = [#tpu.dimension_semantics<parallel>], iteration_bounds = array<i64: 1>, scalar_prefetch = 0 : i64, scratch_operands = 0 : i64, tpu.core_type = #tpu.core_type<tc>, window_params = [{transform_indices = @transform_0, window_bounds = array<i64: 8, 16>}, {transform_indices = @transform_1, window_bounds = array<i64: 8, 1>}, {pipeline_mode = #tpu.pipeline_mode<synchronous>, transform_indices = @transform_2, window_bounds = array<i64: 1, 21>}, {pipeline_mode = #tpu.pipeline_mode<synchronous>, transform_indices = @transform_3, window_bounds = array<i64: 16, 21>}, {pipeline_mode = #tpu.pipeline_mode<synchronous>, transform_indices = @transform_4, window_bounds = array<i64: 1, 21>}, {pipeline_mode = #tpu.pipeline_mode<synchronous>, transform_indices = @transform_5, window_bounds = array<i64: 21, 128>}, {transform_indices = @transform_6, window_bounds = array<i64: 8, 6>}, {transform_indices = @transform_7, window_bounds = array<i64: 8, 128>}]} {
    %c0 = arith.constant 0 : index
    %c0_0 = arith.constant 0 : index
    %0 = vector.load %arg1[%c0, %c0_0] : memref<8x16xf32, #tpu.memory_space<vmem>>, vector<8x16xf32>
    %1 = arith.truncf %0 : vector<8x16xf32> to vector<8x16xbf16>
    %c0_1 = arith.constant 0 : index
    %c0_2 = arith.constant 0 : index
    %2 = vector.load %arg4[%c0_1, %c0_2] : memref<16x21xbf16, #tpu.memory_space<vmem>>, vector<16x21xbf16>
    %cst = arith.constant dense<0.000000e+00> : vector<8x21xf32>
    %3 = tpu.matmul %1, %2, %cst {dimension_numbers = #tpu.dot_dimension_numbers<[1], [0], [0], [1], [0, 0, 1, 1], [], []>} : vector<8x16xbf16>, vector<16x21xbf16>, vector<8x21xf32> -> vector<8x21xf32>
    %c0_3 = arith.constant 0 : index
    %c0_4 = arith.constant 0 : index
    %4 = vector.load %arg5[%c0_3, %c0_4] : memref<1x21xf32, #tpu.memory_space<vmem>>, vector<1x21xf32>
    %5 = vector.broadcast %4 : vector<1x21xf32> to vector<8x21xf32>
    %6 = arith.addf %3, %5 : vector<8x21xf32>
    %c0_5 = arith.constant 0 : index
    %c0_6 = arith.constant 0 : index
    %7 = vector.load %arg3[%c0_5, %c0_6] : memref<1x21xi32, #tpu.memory_space<vmem>>, vector<1x21xi32>
    %c0_7 = arith.constant 0 : index
    %c0_8 = arith.constant 0 : index
    %8 = vector.load %arg2[%c0_7, %c0_8] : memref<8x1xi32, #tpu.memory_space<vmem>>, vector<8x1xi32>
    %9 = vector.broadcast %7 : vector<1x21xi32> to vector<8x21xi32>
    %10 = vector.broadcast %8 : vector<8x1xi32> to vector<8x21xi32>
    %11 = arith.cmpi eq, %9, %10 : vector<8x21xi32>
    %cst_9 = arith.constant 0.000000e+00 : f32
    %12 = vector.broadcast %cst_9 : f32 to vector<8x21xf32>
    %13 = arith.select %11, %6, %12 : vector<8x21xi1>, vector<8x21xf32>
    %c0_10 = arith.constant 0 : index
    %c0_11 = arith.constant 0 : index
    %14 = vector.load %arg6[%c0_10, %c0_11] : memref<21x128xf32, #tpu.memory_space<vmem>>, vector<21x128xf32>
    %cst_12 = arith.constant dense<0.000000e+00> : vector<8x128xf32>
    %15 = tpu.matmul %13, %14, %cst_12 {dimension_numbers = #tpu.dot_dimension_numbers<[1], [0], [0], [1], [0, 0, 1, 1], [], []>} : vector<8x21xf32>, vector<21x128xf32>, vector<8x128xf32> -> vector<8x128xf32>
    %16 = tpu.iota {dimensions = array<i32: 1>} : vector<8x128xi32>
    %c6_i32 = arith.constant 6 : i32
    %17 = vector.broadcast %c6_i32 : i32 to vector<8x128xi32>
    %18 = arith.cmpi slt, %16, %17 : vector<8x128xi32>
    %cst_13 = arith.constant -1.000000e+30 : f32
    %19 = vector.broadcast %cst_13 : f32 to vector<8x128xf32>
    %20 = arith.select %18, %15, %19 : vector<8x128xi1>, vector<8x128xf32>
    %cst_14 = arith.constant dense<0xFF800000> : vector<8xf32>
    %21 = vector.multi_reduction <maximumf>, %20, %cst_14 [1] : vector<8x128xf32> to vector<8xf32>
    %22 = vector.shape_cast %21 : vector<8xf32> to vector<8x1xf32>
    %23 = vector.broadcast %22 : vector<8x1xf32> to vector<8x128xf32>
    %24 = arith.subf %20, %23 : vector<8x128xf32>
    %25 = math.exp %24 : vector<8x128xf32>
    %cst_15 = arith.constant dense<0.000000e+00> : vector<8xf32>
    %26 = vector.multi_reduction <add>, %25, %cst_15 [1] : vector<8x128xf32> to vector<8xf32>
    %27 = vector.shape_cast %26 : vector<8xf32> to vector<8x1xf32>
    %28 = math.log %27 : vector<8x1xf32>
    %29 = tpu.reciprocal %27 {approx = true} : vector<8x1xf32> -> vector<8x1xf32>
    %30 = vector.broadcast %29 : vector<8x1xf32> to vector<8x128xf32>
    %31 = arith.mulf %25, %30 : vector<8x128xf32>
    %32 = vector.broadcast %28 : vector<8x1xf32> to vector<8x128xf32>
    %33 = arith.subf %24, %32 : vector<8x128xf32>
    %34 = arith.mulf %31, %33 : vector<8x128xf32>
    %cst_16 = arith.constant 0.000000e+00 : f32
    %35 = vector.broadcast %cst_16 : f32 to vector<8x128xf32>
    %36 = arith.select %18, %34, %35 : vector<8x128xi1>, vector<8x128xf32>
    %cst_17 = arith.constant dense<0.000000e+00> : vector<8xf32>
    %37 = vector.multi_reduction <add>, %36, %cst_17 [1] : vector<8x128xf32> to vector<8xf32>
    %38 = vector.shape_cast %37 : vector<8xf32> to vector<8x1xf32>
    %cst_18 = arith.constant 0.000000e+00 : f32
    %39 = vector.broadcast %cst_18 : f32 to vector<8x1xf32>
    %40 = arith.subf %39, %38 : vector<8x1xf32>
    %41 = tpu.iota {dimensions = array<i32: 1>} : vector<8x6xi32>
    %42 = vector.extract_strided_slice %15 {offsets = [0, 0], sizes = [8, 6], strides = [1, 1]} : vector<8x128xf32> to vector<8x6xf32>
    %c0_19 = arith.constant 0 : index
    %c0_20 = arith.constant 0 : index
    %43 = vector.load %arg7[%c0_19, %c0_20] : memref<8x6xf32, #tpu.memory_space<vmem>>, vector<8x6xf32>
    %44 = arith.addf %42, %43 : vector<8x6xf32>
    %cst_21 = arith.constant dense<0xFF800000> : vector<8xf32>
    %45 = vector.multi_reduction <maximumf>, %44, %cst_21 [1] : vector<8x6xf32> to vector<8xf32>
    %46 = vector.shape_cast %45 : vector<8xf32> to vector<8x1xf32>
    %47 = vector.broadcast %46 : vector<8x1xf32> to vector<8x6xf32>
    %48 = arith.cmpf oge, %44, %47 : vector<8x6xf32>
    %c6_i32_22 = arith.constant 6 : i32
    %49 = vector.broadcast %c6_i32_22 : i32 to vector<8x6xi32>
    %50 = arith.select %48, %41, %49 : vector<8x6xi1>, vector<8x6xi32>
    %cst_23 = arith.constant dense<2147483647> : vector<8xi32>
    %51 = vector.multi_reduction <minsi>, %50, %cst_23 [1] : vector<8x6xi32> to vector<8xi32>
    %52 = vector.shape_cast %51 : vector<8xi32> to vector<8x1xi32>
    %53 = vector.broadcast %52 : vector<8x1xi32> to vector<8x128xi32>
    %54 = arith.cmpi eq, %16, %53 : vector<8x128xi32>
    %cst_24 = arith.constant 0.000000e+00 : f32
    %55 = vector.broadcast %cst_24 : f32 to vector<8x128xf32>
    %56 = arith.select %54, %33, %55 : vector<8x128xi1>, vector<8x128xf32>
    %cst_25 = arith.constant dense<0.000000e+00> : vector<8xf32>
    %57 = vector.multi_reduction <add>, %56, %cst_25 [1] : vector<8x128xf32> to vector<8xf32>
    %58 = vector.shape_cast %57 : vector<8xf32> to vector<8x1xf32>
    %c6_i32_26 = arith.constant 6 : i32
    %59 = vector.broadcast %c6_i32_26 : i32 to vector<8x128xi32>
    %60 = arith.cmpi eq, %16, %59 : vector<8x128xi32>
    %cst_27 = arith.constant 0.000000e+00 : f32
    %61 = vector.broadcast %cst_27 : f32 to vector<8x128xf32>
    %62 = arith.select %60, %15, %61 : vector<8x128xi1>, vector<8x128xf32>
    %cst_28 = arith.constant dense<0.000000e+00> : vector<8xf32>
    %63 = vector.multi_reduction <add>, %62, %cst_28 [1] : vector<8x128xf32> to vector<8xf32>
    %64 = vector.shape_cast %63 : vector<8xf32> to vector<8x1xf32>
    %65 = arith.sitofp %52 : vector<8x1xi32> to vector<8x1xf32>
    %c0_i32 = arith.constant 0 : i32
    %66 = vector.broadcast %c0_i32 : i32 to vector<8x128xi32>
    %67 = arith.cmpi eq, %16, %66 : vector<8x128xi32>
    %cst_29 = arith.constant 0.000000e+00 : f32
    %68 = vector.shape_cast %65 : vector<8x1xf32> to vector<8x1xf32>
    %69 = vector.broadcast %68 : vector<8x1xf32> to vector<8x128xf32>
    %70 = vector.broadcast %cst_29 : f32 to vector<8x128xf32>
    %71 = arith.select %67, %69, %70 : vector<8x128xi1>, vector<8x128xf32>
    %c1_i32 = arith.constant 1 : i32
    %72 = vector.broadcast %c1_i32 : i32 to vector<8x128xi32>
    %73 = arith.cmpi eq, %16, %72 : vector<8x128xi32>
    %cst_30 = arith.constant 0.000000e+00 : f32
    %74 = vector.shape_cast %58 : vector<8x1xf32> to vector<8x1xf32>
    %75 = vector.broadcast %74 : vector<8x1xf32> to vector<8x128xf32>
    %76 = vector.broadcast %cst_30 : f32 to vector<8x128xf32>
    %77 = arith.select %73, %75, %76 : vector<8x128xi1>, vector<8x128xf32>
    %78 = arith.addf %71, %77 : vector<8x128xf32>
    %c2_i32 = arith.constant 2 : i32
    %79 = vector.broadcast %c2_i32 : i32 to vector<8x128xi32>
    %80 = arith.cmpi eq, %16, %79 : vector<8x128xi32>
    %cst_31 = arith.constant 0.000000e+00 : f32
    %81 = vector.shape_cast %40 : vector<8x1xf32> to vector<8x1xf32>
    %82 = vector.broadcast %81 : vector<8x1xf32> to vector<8x128xf32>
    %83 = vector.broadcast %cst_31 : f32 to vector<8x128xf32>
    %84 = arith.select %80, %82, %83 : vector<8x128xi1>, vector<8x128xf32>
    %85 = arith.addf %78, %84 : vector<8x128xf32>
    %c3_i32 = arith.constant 3 : i32
    %86 = vector.broadcast %c3_i32 : i32 to vector<8x128xi32>
    %87 = arith.cmpi eq, %16, %86 : vector<8x128xi32>
    %cst_32 = arith.constant 0.000000e+00 : f32
    %88 = vector.shape_cast %64 : vector<8x1xf32> to vector<8x1xf32>
    %89 = vector.broadcast %88 : vector<8x1xf32> to vector<8x128xf32>
    %90 = vector.broadcast %cst_32 : f32 to vector<8x128xf32>
    %91 = arith.select %87, %89, %90 : vector<8x128xi1>, vector<8x128xf32>
    %92 = arith.addf %85, %91 : vector<8x128xf32>
    %c0_33 = arith.constant 0 : index
    %c0_34 = arith.constant 0 : index
    %93 = vector.load %arg8[%c0_33, %c0_34] : memref<8x128xf32, #tpu.memory_space<vmem>>, vector<8x128xf32>
    tpu.vector_store %arg8[%c0_33, %c0_34], %92 {strides = array<i32>} : memref<8x128xf32, #tpu.memory_space<vmem>>, vector<8x128xf32>,
    return
  }
  func.func @transform_0(%arg0: i32) -> (i32, i32) {
    %c0_i32 = arith.constant 0 : i32
    %c0_i32_0 = arith.constant 0 : i32
    return %arg0, %c0_i32 : i32, i32
  }
  func.func @transform_1(%arg0: i32) -> (i32, i32) {
    %c0_i32 = arith.constant 0 : i32
    %c0_i32_0 = arith.constant 0 : i32
    return %arg0, %c0_i32 : i32, i32
  }
  func.func @transform_2(%arg0: i32) -> (i32, i32) {
    %c0_i32 = arith.constant 0 : i32
    %c0_i32_0 = arith.constant 0 : i32
    %c0_i32_1 = arith.constant 0 : i32
    return %c0_i32, %c0_i32_0 : i32, i32
  }
  func.func @transform_3(%arg0: i32) -> (i32, i32) {
    %c0_i32 = arith.constant 0 : i32
    %c0_i32_0 = arith.constant 0 : i32
    %c0_i32_1 = arith.constant 0 : i32
    return %c0_i32, %c0_i32_0 : i32, i32
  }
  func.func @transform_4(%arg0: i32) -> (i32, i32) {
    %c0_i32 = arith.constant 0 : i32
    %c0_i32_0 = arith.constant 0 : i32
    %c0_i32_1 = arith.constant 0 : i32
    return %c0_i32, %c0_i32_0 : i32, i32
  }
  func.func @transform_5(%arg0: i32) -> (i32, i32) {
    %c0_i32 = arith.constant 0 : i32
    %c0_i32_0 = arith.constant 0 : i32
    %c0_i32_1 = arith.constant 0 : i32
    return %c0_i32, %c0_i32_0 : i32, i32
  }
  func.func @transform_6(%arg0: i32) -> (i32, i32) {
    %c0_i32 = arith.constant 0 : i32
    %c0_i32_0 = arith.constant 0 : i32
    return %arg0, %c0_i32 : i32, i32
  }
  func.func @transform_7(%arg0: i32) -> (i32, i32) {
    %c0_i32 = arith.constant 0 : i32
    %c0_i32_0 = arith.constant 0 : i32
    return %arg0, %c0_i32 : i32, i32
  }
}

</mosaic_0001>

<bundles_post_ra>
// kernel: tpu_custom_call.1
= control target key start
LH: loop header
LB: loop body
LE: loop exit
PB: predicated region body
PF: predicated region fallthrough
CT: control target
= control target key end

     0   :  { %12 = vsyncpa [#allocation3], 0  ;;  %s571_s0 = inlined_call_operand.hbm [shape: f32[8,16], index: 0, kind: input, shape index: {}]   ;;  %s572_s1 = inlined_call_operand.vmem [shape: s32[8,1], index: 1, kind: input, shape index: {}]   ;;  %s573_s2 = inlined_call_operand.vmem [shape: s32[1,21], index: 2, kind: input, shape index: {}]   ;;  %s574_s3 = inlined_call_operand.hbm [shape: bf16[16,21], index: 3, kind: input, shape index: {}]   ;;  %s575_s4 = inlined_call_operand.vmem [shape: f32[1,21], index: 4, kind: input, shape index: {}]   ;;  %s576_s5 = inlined_call_operand.vmem [shape: f32[21,128], index: 5, kind: input, shape index: {}]   ;;  %s577_s6 = inlined_call_operand.hbm [shape: f32[8,6], index: 6, kind: input, shape index: {}]   ;;  %s578_s7 = inlined_call_operand.hbm [shape: f32[8,128], index: 7, kind: output, shape index: {}]  }
   0x1   :  { %13 = vsyncpa [#allocation6], 0 }
   0x2   :  { %14 = vsyncpa [#allocation4], 0  ;;  %s441_s24 = smov [#allocation5]   ;;  %s347_s28 = scalar_lea.hbm %s574_s3, 128 }
   0x3   :  { %s34_s25 = sshll.u32 %s441_s24, 4  ;;  %p348_p0 = scmp.ne.s32.totalorder %s574_s3, %s347_s28  ;;  %s35_s25 = int_to_ptr.vmem [resolvable:$true] %s34_s25 }
   0x4   :  { %p351_p1 = scmp.lt.u32.totalorder %s347_s28, %s574_s3 }
   0x6   :  { %p353_p2 = pnand %p351_p1, %p348_p0 }
   0x8   :  { %356 = shalt.err (!%p353_p2)
}
   0x9   :  { %s357_s10 = scalar_lea.vmem %s35_s25, 128  ;;  %p362_p4 = scmp.lt.s32.totalorder %s35_s25, %s35_s25 }
   0xa   :  { %p358_p3 = scmp.ne.s32.totalorder %s35_s25, %s357_s10  ;;  %p363_p5 = scmp.lt.s32.totalorder %s357_s10, %s357_s10 }
   0xc   :  { %p364_p6 = por %p363_p5, %p362_p4 }
   0xe   :  { %p365_p7 = pnand %p364_p6, %p358_p3 }
  0x10   :  { %368 = shalt.err (!%p365_p7)
}
  0x11   :  { %s442_s11 = smov 64   ;;  %s443_s12 = smov 4  }
  0x12   :  { %40 = dma.hbm_to_vmem [thread:$0]  %s574_s3, 128, %s35_s25, [#allocation6], %s442_s11, %s442_s11, %s443_s12  }
  0x13   :  { %s444_s15 = smov [#allocation2]   ;;  %s445_s17 = smov [#allocation7]  }
  0x14   :  { %s21_s16 = sshll.u32 %s444_s15, 4  ;;  %s51_s18 = sshll.u32 %s445_s17, 4  ;;  %s22_s16 = int_to_ptr.vmem [resolvable:$true] %s21_s16  ;;  %s52_s18 = int_to_ptr.vmem [resolvable:$true] %s51_s18 }
  0x15   :  { %s369_s21 = scalar_lea.hbm %s571_s0, 128 }
  0x16   :  { %p370_p8 = scmp.ne.s32.totalorder %s571_s0, %s369_s21  ;;  %p373_p9 = scmp.lt.u32.totalorder %s369_s21, %s571_s0 }
  0x18   :  { %p375_p10 = pnand %p373_p9, %p370_p8 }
  0x1a   :  { %378 = shalt.err (!%p375_p10)
}
  0x1b   :  { %s379_s3 = scalar_lea.vmem %s22_s16, 128  ;;  %p384_p12 = scmp.lt.s32.totalorder %s22_s16, %s22_s16 }
  0x1c   :  { %p380_p11 = scmp.ne.s32.totalorder %s22_s16, %s379_s3  ;;  %p385_p13 = scmp.lt.s32.totalorder %s379_s3, %s379_s3 }
  0x1e   :  { %p386_p0 = por %p385_p13, %p384_p12 }
  0x20   :  { %p387_p1 = pnand %p386_p0, %p380_p11 }
  0x22   :  { %390 = shalt.err (!%p387_p1)
}
  0x23   :  { %24 = dma.hbm_to_vmem [thread:$0]  %s571_s0, 128, %s22_s16, [#allocation3]  }
  0x24   :  { %s391_s30 = scalar_lea.hbm %s577_s6, 128 }
  0x25   :  { %p392_p2 = scmp.ne.s32.totalorder %s577_s6, %s391_s30  ;;  %p395_p3 = scmp.lt.u32.totalorder %s391_s30, %s577_s6 }
  0x27   :  { %p397_p4 = pnand %p395_p3, %p392_p2 }
  0x29   :  { %400 = shalt.err (!%p397_p4)
}
  0x2a   :  { %s401_s12 = scalar_lea.vmem %s52_s18, 128  ;;  %p406_p6 = scmp.lt.s32.totalorder %s52_s18, %s52_s18 }
  0x2b   :  { %p402_p5 = scmp.ne.s32.totalorder %s52_s18, %s401_s12  ;;  %p407_p7 = scmp.lt.s32.totalorder %s401_s12, %s401_s12 }
  0x2d   :  { %p408_p8 = por %p407_p7, %p406_p6 }
  0x2f   :  { %p409_p9 = pnand %p408_p8, %p402_p5 }
  0x31   :  { %412 = shalt.err (!%p409_p9)
}
  0x32   :  { %54 = dma.hbm_to_vmem [thread:$0]  %s577_s6, 128, %s52_s18, [#allocation6]  }
  0x33   :  { %435 = dma.done.wait [#allocation3], 128  }
  0x34   :  { %436 = vsyncadd [#allocation3], 4294967168 }
  0x35   :  { %437 = dma.done.wait [#allocation6], 256  }
  0x36   :  { %438 = vsyncadd [#allocation6], 4294967040  ;;  %v446_v0 = vmov 0.0   ;;  %vm447_vm0 = vmmov 0   ;;  %v448_v1 = vmov 0   ;;  %v449_v2 = vmov 0.0|0.0  }
  0x37   :  { %311 = vmatprep.subr.bf16.mxu0 %v446_v0  ;;  %313 = vmatprep.mubr.msk.bf16.mxu0 %vm447_vm0, %v446_v0  ;;  %v340_v3 = vld [vmem:[#allocation5] sm:$0xff]   ;;  %v65_v4 = vld [vmem:[#allocation2] sm:$0xff]  ;;  %vm82_vm1 = vcmask 130048   ;;  %v139_v10 = vld [vmem:[%s576_s5 + $0x10] sm:$0x1f]  ;;  %vm144_vm2 = vcmask 1044480   ;;  %v218_v20 = vlaneseq }
  0x38   :  { %339 = vset.pattern.permute.xlu0 %v448_v1  ;;  %326 = vmatprep.subr.bf16.mxu1 %v449_v2  ;;  %v127_v5 = vld [vmem:[%s572_s1] sm:$0xff]  ;;  %v66_v7 = vpack.c.bf16 %v65_v4, %v65_v4  ;;  %v138_v8 = vld [vmem:[%s576_s5 + $0x8] sm:$0xff]  ;;  %vm140_vm4 = vcmask 171008   ;;  %v239_v22 = vld [vmem:[#allocation7] sm:$0xff]  ;;  %vm241_vm6 = vcmask 48128  }
  0x39   :  { %323 = vmatprep.mubr.msk.f32.mxu1 %vm447_vm0, %v446_v0  ;;  %v137_v6 = vld [vmem:[%s576_s5] sm:$0xff]  ;;  %312 = vmatpush3.bf16.msra.mxu0 %v340_v3  ;;  %v545_v21 = vand.u32 127, %v218_v20 }
  0x3a   :  { %133 = vperm.xlu0 %339, %v127_v5   ;;  %v327_v9 = vpack.c.bf16 %v138_v8, %v137_v6  ;;  %v302_v12 = vld [vmem:[%s573_s2] ss:$0 sm:$0xff]  ;;  %s450_s2 = smov [#allocation8]  }
  0x3b   :  { %v299_v13 = vld [vmem:[%s575_s4] ss:$0 sm:$0xff]  ;;  %vm220_vm5 = vcmp.lt.s32.totalorder %v545_v21, 6  ;;  %vm266_vm10 = vcmp.eq.s32.totalorder %v545_v21, 6  ;;  %vm271_vm11 = vcmp.eq.s32.totalorder %v545_v21, 0  ;;  %vm273_vm12 = vcmp.eq.s32.totalorder %v545_v21, 1 }
  0x3c   :  { %314 = vmatmul.mubr.msk.bf16.vlgmr.msra.gmra.mrb[0].mxu0 %vm82_vm1, %v66_v7  ;;  %328 = vmatpush3.bf16.msra.mxu1 %v327_v9  ;;  %vm276_vm13 = vcmp.eq.s32.totalorder %v545_v21, 2  ;;  %vm279_vm14 = vcmp.eq.s32.totalorder %v545_v21, 3  ;;  %s289_s4 = sshll.u32 %s450_s2, 4  ;;  %s290_s4 = int_to_ptr.vmem [resolvable:$true] %s289_s4 }
  0x3d   :  { %321 = vmatprep.subr.mxu1 %v446_v0  ;;  %s413_s5 = scalar_lea.vmem %s290_s4, 128  ;;  %p418_p11 = scmp.lt.s32.totalorder %s290_s4, %s290_s4 }
  0x3e   :  { %p414_p10 = scmp.ne.s32.totalorder %s290_s4, %s413_s5  ;;  %p419_p12 = scmp.lt.s32.totalorder %s413_s5, %s413_s5 }
  0x40   :  { %322 = vmatpush3.msk.msra.mxu1 %vm144_vm2, %v139_v10  ;;  %p420_p13 = por %p419_p12, %p418_p11 }
  0x42   :  { %p421_p0 = pnand %p420_p13, %p414_p10 }
  0xb9   :  { %v134_v11 = vpop.permute.xlu0 %133 }
  0xba   :  { %vm135_vm3 = vcmp.eq.s32.totalorder %v302_v12, %v134_v11 }
 0x10f   :  { %v120_v14 = vpop.f32.mrb[0].mxu0 }
 0x110   :  { %v121_v15 = vadd.f32 %v299_v13, %v120_v14  ;;  %v315_v16 = vpop.f32.mrb[1].mxu0 }
 0x111   :  { %v123_v17 = vpop.f32.mrb[2].mxu0 }
 0x112   :  { %v136_v18 = vsel %vm135_vm3, %v121_v15, 0.0  ;;  %v316_v19 = vpop.f32.mrb[3].mxu0 }
 0x113   :  { %324 = vmatmul.mubr.msk.f32.vlgmr.msra.gmra.mrb[0].mxu1 %vm140_vm4, %v136_v18 }
 0x1e6   :  { %v214_v23 = vpop.f32.mrb[0].mxu1 }
 0x1e7   :  { %v325_v24 = vpop.f32.mrb[1].mxu1  ;;  %v221_v25 = vsel %vm220_vm5, %v214_v23, -1e+30  ;;  %v240_v26 = vadd.f32 %v239_v22, %v214_v23  ;;  %v267_v55 = vsel %vm266_vm10, %v214_v23, 0.0 }
 0x1e8   :  { %222 = vmax.xlane.f32.xlu1 %v221_v25 }
 0x1e9   :  { %v242_v27 = vsel %vm241_vm6, %v240_v26, -inf }
 0x1ea   :  { %243 = vmax.xlane.f32.xlu0 %v242_v27 }
 0x275   :  { %v223_v28 = vpop.xlane.xlu1 %222 }
 0x276   :  { %v224_v29 = vsub.f32 %v221_v25, %v223_v28 }
 0x277   :  { %v244_v30 = vpop.xlane.xlu0 %243 }
 0x278   :  { %v225_v31 = vmul.f32 1.442695, %v224_v29  ;;  %vm245_vm7 = vcmp.ge.f32.partialorder %v240_v26, %v244_v30 }
 0x279   :  { %v246_v32 = vsel %vm245_vm7, %v545_v21, 6 }
 0x27a   :  { %341 = vpow2.f32 %v225_v31  ;;  %v247_v33 = vsel %vm241_vm6, %v246_v32, 2147483647 }
 0x27b   :  { %v249_v34 = vshra.s32 %v247_v33, 16  ;;  %v248_v37 = vand.u32 65535, %v247_v33 }
 0x27d   :  { %v251_v35 = vcvt.s32.f32 %v249_v34  ;;  %v250_v39 = vcvt.s32.f32 %v248_v37 }
 0x27f   :  { %252 = vmin.xlane.f32.xlu1 %v251_v35 }
 0x284   :  { %v342_v36 = vpop.eup %341 }
 0x285   :  { %227 = vadd.xlane.f32.xlu1 %v342_v36 }
 0x30c   :  { %v253_v38 = vpop.xlane.xlu1 %252 }
 0x30d   :  { %vm254_vm8 = vcmp.eq.f32.partialorder %v251_v35, %v253_v38  ;;  %v259_v49 = vcvt.f32.s32 %v253_v38 }
 0x30e   :  { %v255_v40 = vsel %vm254_vm8, %v250_v39, inf }
 0x30f   :  { %256 = vmin.xlane.f32.xlu1 %v255_v40  ;;  %v260_v51 = vshll.u32 %v259_v49, 16 }
 0x312   :  { %v228_v41 = vpop.xlane.xlu1 %227 }
 0x313   :  { %343 = vlog2.f32 %v228_v41 }
 0x314   :  { %345 = vrcp.f32 %v228_v41 }
 0x31d   :  { %v344_v42 = vpop.eup %343 }
 0x31e   :  { %v346_v43 = vpop.eup %345  ;;  %v230_v44 = vmul.f32 0.6931472, %v344_v42 }
 0x31f   :  { %v232_v45 = vmul.f32 %v346_v43, %v342_v36 }
 0x320   :  { %v233_v46 = vsub.f32 %v224_v29, %v230_v44 }
 0x322   :  { %v234_v47 = vmul.f32 %v233_v46, %v232_v45 }
 0x324   :  { %v235_v48 = vsel %vm220_vm5, %v234_v47, 0.0 }
 0x325   :  { %236 = vadd.xlane.f32.xlu1 %v235_v48 }
 0x39c   :  { %v257_v50 = vpop.xlane.xlu1 %256 }
 0x39d   :  { %v258_v52 = vcvt.f32.s32 %v257_v50 }
 0x39f   :  { %v261_v53 = vadd.s32 %v260_v51, %v258_v52 }
 0x3a1   :  { %vm262_vm9 = vcmp.eq.s32.totalorder %v545_v21, %v261_v53  ;;  %v270_v57 = vcvt.s32.f32 %v261_v53 }
 0x3a2   :  { %v263_v54 = vsel %vm262_vm9, %v233_v46, 0.0 }
 0x3a3   :  { %264 = vadd.xlane.f32.xlu1 %v263_v54  ;;  %v272_v60 = vsel %vm271_vm11, %v270_v57, 0.0 }
 0x3a7   :  { %268 = vadd.xlane.f32.xlu1 %v267_v55 }
 0x3b2   :  { %v237_v56 = vpop.xlane.xlu1 %236 }
 0x3b3   :  { %v238_v58 = vsub.f32 0.0, %v237_v56 }
 0x3b5   :  { %v277_v63 = vsel %vm276_vm13, %v238_v58, 0.0 }
 0x430   :  { %v265_v59 = vpop.xlane.xlu1 %264 }
 0x431   :  { %v274_v61 = vsel %vm273_vm12, %v265_v59, 0.0 }
 0x432   :  { %v275_v62 = vadd.f32 %v274_v61, %v272_v60 }
 0x434   :  { %v278_v0 = vadd.f32 %v277_v63, %v275_v62  ;;  %v269_v1 = vpop.xlane.xlu1 %268 }
 0x435   :  { %v280_v2 = vsel %vm279_vm14, %v269_v1, 0.0 }
 0x436   :  { %v281_v3 = vadd.f32 %v280_v2, %v278_v0 }
 0x438   :  { %282 = vst [vmem:[#allocation8] sm:$0xff] %v281_v3 }
 0x439   :  { %424 = shalt.err (!%p421_p0)
}
 0x43a   :  { %s425_s3 = scalar_lea.hbm %s578_s7, 128 }
 0x43b   :  { %p426_p1 = scmp.ne.s32.totalorder %s578_s7, %s425_s3  ;;  %p429_p2 = scmp.lt.u32.totalorder %s425_s3, %s578_s7 }
 0x43d   :  { %p431_p3 = pnand %p429_p2, %p426_p1 }
 0x43f   :  { %434 = shalt.err (!%p431_p3)
}
 0x440   :  { %292 = dma.vmem_to_hbm [thread:$0]  %s290_s4, 128, %s578_s7, [#allocation4]  }
 0x441   :  { %439 = dma.done.wait [#allocation4], 128  }
 0x442   :  { %440 = vsyncadd [#allocation4], 4294967168 }
 0x443   :  { %296 = vsyncpa [#allocation3], 1 }
 0x444   :  { %297 = vsyncpa [#allocation6], 1 }
 0x445   :  { %298 = vsyncpa [#allocation4], 1 }

// kernel: tpu_custom_call.1
= control target key start
LH: loop header
LB: loop body
LE: loop exit
PB: predicated region body
PF: predicated region fallthrough
CT: control target
= control target key end

     0   :  { %12 = vsyncpa [#allocation3], 0  ;;  %s571_s0 = inlined_call_operand.hbm [shape: f32[8,16], index: 0, kind: input, shape index: {}]   ;;  %s572_s1 = inlined_call_operand.vmem [shape: s32[8,1], index: 1, kind: input, shape index: {}]   ;;  %s573_s2 = inlined_call_operand.vmem [shape: s32[1,21], index: 2, kind: input, shape index: {}]   ;;  %s574_s3 = inlined_call_operand.hbm [shape: bf16[16,21], index: 3, kind: input, shape index: {}]   ;;  %s575_s4 = inlined_call_operand.vmem [shape: f32[1,21], index: 4, kind: input, shape index: {}]   ;;  %s576_s5 = inlined_call_operand.vmem [shape: f32[21,128], index: 5, kind: input, shape index: {}]   ;;  %s577_s6 = inlined_call_operand.hbm [shape: f32[8,6], index: 6, kind: input, shape index: {}]   ;;  %s578_s7 = inlined_call_operand.hbm [shape: f32[8,128], index: 7, kind: output, shape index: {}]  }
   0x1   :  { %13 = vsyncpa [#allocation6], 0 }
   0x2   :  { %14 = vsyncpa [#allocation4], 0  ;;  %s441_s24 = smov [#allocation5]   ;;  %s347_s28 = scalar_lea.hbm %s574_s3, 128 }
   0x3   :  { %s34_s25 = sshll.u32 %s441_s24, 4  ;;  %p348_p0 = scmp.ne.s32.totalorder %s574_s3, %s347_s28  ;;  %s35_s25 = int_to_ptr.vmem [resolvable:$true] %s34_s25 }
   0x4   :  { %p351_p1 = scmp.lt.u32.totalorder %s347_s28, %s574_s3 }
   0x6   :  { %p353_p2 = pnand %p351_p1, %p348_p0 }
   0x8   :  { %356 = shalt.err (!%p353_p2)
}
   0x9   :  { %s357_s10 = scalar_lea.vmem %s35_s25, 128  ;;  %p362_p4 = scmp.lt.s32.totalorder %s35_s25, %s35_s25 }
   0xa   :  { %p358_p3 = scmp.ne.s32.totalorder %s35_s25, %s357_s10  ;;  %p363_p5 = scmp.lt.s32.totalorder %s357_s10, %s357_s10 }
   0xc   :  { %p364_p6 = por %p363_p5, %p362_p4 }
   0xe   :  { %p365_p7 = pnand %p364_p6, %p358_p3 }
  0x10   :  { %368 = shalt.err (!%p365_p7)
}
  0x11   :  { %s442_s11 = smov 64   ;;  %s443_s12 = smov 4  }
  0x12   :  { %40 = dma.hbm_to_vmem [thread:$0]  %s574_s3, 128, %s35_s25, [#allocation6], %s442_s11, %s442_s11, %s443_s12  }
  0x13   :  { %s444_s15 = smov [#allocation2]   ;;  %s445_s17 = smov [#allocation7]  }
  0x14   :  { %s21_s16 = sshll.u32 %s444_s15, 4  ;;  %s51_s18 = sshll.u32 %s445_s17, 4  ;;  %s22_s16 = int_to_ptr.vmem [resolvable:$true] %s21_s16  ;;  %s52_s18 = int_to_ptr.vmem [resolvable:$true] %s51_s18 }
  0x15   :  { %s369_s21 = scalar_lea.hbm %s571_s0, 128 }
  0x16   :  { %p370_p8 = scmp.ne.s32.totalorder %s571_s0, %s369_s21  ;;  %p373_p9 = scmp.lt.u32.totalorder %s369_s21, %s571_s0 }
  0x18   :  { %p375_p10 = pnand %p373_p9, %p370_p8 }
  0x1a   :  { %378 = shalt.err (!%p375_p10)
}
  0x1b   :  { %s379_s3 = scalar_lea.vmem %s22_s16, 128  ;;  %p384_p12 = scmp.lt.s32.totalorder %s22_s16, %s22_s16 }
  0x1c   :  { %p380_p11 = scmp.ne.s32.totalorder %s22_s16, %s379_s3  ;;  %p385_p13 = scmp.lt.s32.totalorder %s379_s3, %s379_s3 }
  0x1e   :  { %p386_p0 = por %p385_p13, %p384_p12 }
  0x20   :  { %p387_p1 = pnand %p386_p0, %p380_p11 }
  0x22   :  { %390 = shalt.err (!%p387_p1)
}
  0x23   :  { %24 = dma.hbm_to_vmem [thread:$0]  %s571_s0, 128, %s22_s16, [#allocation3]  }
  0x24   :  { %s391_s30 = scalar_lea.hbm %s577_s6, 128 }
  0x25   :  { %p392_p2 = scmp.ne.s32.totalorder %s577_s6, %s391_s30  ;;  %p395_p3 = scmp.lt.u32.totalorder %s391_s30, %s577_s6 }
  0x27   :  { %p397_p4 = pnand %p395_p3, %p392_p2 }
  0x29   :  { %400 = shalt.err (!%p397_p4)
}
  0x2a   :  { %s401_s12 = scalar_lea.vmem %s52_s18, 128  ;;  %p406_p6 = scmp.lt.s32.totalorder %s52_s18, %s52_s18 }
  0x2b   :  { %p402_p5 = scmp.ne.s32.totalorder %s52_s18, %s401_s12  ;;  %p407_p7 = scmp.lt.s32.totalorder %s401_s12, %s401_s12 }
  0x2d   :  { %p408_p8 = por %p407_p7, %p406_p6 }
  0x2f   :  { %p409_p9 = pnand %p408_p8, %p402_p5 }
  0x31   :  { %412 = shalt.err (!%p409_p9)
}
  0x32   :  { %54 = dma.hbm_to_vmem [thread:$0]  %s577_s6, 128, %s52_s18, [#allocation6]  }
  0x33   :  { %435 = dma.done.wait [#allocation3], 128  }
  0x34   :  { %436 = vsyncadd [#allocation3], 4294967168 }
  0x35   :  { %437 = dma.done.wait [#allocation6], 256  }
  0x36   :  { %438 = vsyncadd [#allocation6], 4294967040  ;;  %v446_v0 = vmov 0.0   ;;  %vm447_vm0 = vmmov 0   ;;  %v448_v1 = vmov 0   ;;  %v449_v2 = vmov 0.0|0.0  }
  0x37   :  { %311 = vmatprep.subr.bf16.mxu0 %v446_v0  ;;  %313 = vmatprep.mubr.msk.bf16.mxu0 %vm447_vm0, %v446_v0  ;;  %v340_v3 = vld [vmem:[#allocation5] sm:$0xff]   ;;  %v65_v4 = vld [vmem:[#allocation2] sm:$0xff]  ;;  %vm82_vm1 = vcmask 130048   ;;  %v139_v10 = vld [vmem:[%s576_s5 + $0x10] sm:$0x1f]  ;;  %vm144_vm2 = vcmask 1044480   ;;  %v218_v20 = vlaneseq }
  0x38   :  { %339 = vset.pattern.permute.xlu0 %v448_v1  ;;  %326 = vmatprep.subr.bf16.mxu1 %v449_v2  ;;  %v127_v5 = vld [vmem:[%s572_s1] sm:$0xff]  ;;  %v66_v7 = vpack.c.bf16 %v65_v4, %v65_v4  ;;  %v138_v8 = vld [vmem:[%s576_s5 + $0x8] sm:$0xff]  ;;  %vm140_vm4 = vcmask 171008   ;;  %v239_v22 = vld [vmem:[#allocation7] sm:$0xff]  ;;  %vm241_vm6 = vcmask 48128  }
  0x39   :  { %323 = vmatprep.mubr.msk.f32.mxu1 %vm447_vm0, %v446_v0  ;;  %v137_v6 = vld [vmem:[%s576_s5] sm:$0xff]  ;;  %312 = vmatpush3.bf16.msra.mxu0 %v340_v3  ;;  %v545_v21 = vand.u32 127, %v218_v20 }
  0x3a   :  { %133 = vperm.xlu0 %339, %v127_v5   ;;  %v327_v9 = vpack.c.bf16 %v138_v8, %v137_v6  ;;  %v302_v12 = vld [vmem:[%s573_s2] ss:$0 sm:$0xff]  ;;  %s450_s2 = smov [#allocation8]  }
  0x3b   :  { %v299_v13 = vld [vmem:[%s575_s4] ss:$0 sm:$0xff]  ;;  %vm220_vm5 = vcmp.lt.s32.totalorder %v545_v21, 6  ;;  %vm266_vm10 = vcmp.eq.s32.totalorder %v545_v21, 6  ;;  %vm271_vm11 = vcmp.eq.s32.totalorder %v545_v21, 0  ;;  %vm273_vm12 = vcmp.eq.s32.totalorder %v545_v21, 1 }
  0x3c   :  { %314 = vmatmul.mubr.msk.bf16.vlgmr.msra.gmra.mrb[0].mxu0 %vm82_vm1, %v66_v7  ;;  %328 = vmatpush3.bf16.msra.mxu1 %v327_v9  ;;  %vm276_vm13 = vcmp.eq.s32.totalorder %v545_v21, 2  ;;  %vm279_vm14 = vcmp.eq.s32.totalorder %v545_v21, 3  ;;  %s289_s4 = sshll.u32 %s450_s2, 4  ;;  %s290_s4 = int_to_ptr.vmem [resolvable:$true] %s289_s4 }
  0x3d   :  { %321 = vmatprep.subr.mxu1 %v446_v0  ;;  %s413_s5 = scalar_lea.vmem %s290_s4, 128  ;;  %p418_p11 = scmp.lt.s32.totalorder %s290_s4, %s290_s4 }
  0x3e   :  { %p414_p10 = scmp.ne.s32.totalorder %s290_s4, %s413_s5  ;;  %p419_p12 = scmp.lt.s32.totalorder %s413_s5, %s413_s5 }
  0x40   :  { %322 = vmatpush3.msk.msra.mxu1 %vm144_vm2, %v139_v10  ;;  %p420_p13 = por %p419_p12, %p418_p11 }
  0x42   :  { %p421_p0 = pnand %p420_p13, %p414_p10 }
  0xb9   :  { %v134_v11 = vpop.permute.xlu0 %133 }
  0xba   :  { %vm135_vm3 = vcmp.eq.s32.totalorder %v302_v12, %v134_v11 }
 0x10f   :  { %v120_v14 = vpop.f32.mrb[0].mxu0 }
 0x110   :  { %v121_v15 = vadd.f32 %v299_v13, %v120_v14  ;;  %v315_v16 = vpop.f32.mrb[1].mxu0 }
 0x111   :  { %v123_v17 = vpop.f32.mrb[2].mxu0 }
 0x112   :  { %v136_v18 = vsel %vm135_vm3, %v121_v15, 0.0  ;;  %v316_v19 = vpop.f32.mrb[3].mxu0 }
 0x113   :  { %324 = vmatmul.mubr.msk.f32.vlgmr.msra.gmra.mrb[0].mxu1 %vm140_vm4, %v136_v18 }
 0x1e6   :  { %v214_v23 = vpop.f32.mrb[0].mxu1 }
 0x1e7   :  { %v325_v24 = vpop.f32.mrb[1].mxu1  ;;  %v221_v25 = vsel %vm220_vm5, %v214_v23, -1e+30  ;;  %v240_v26 = vadd.f32 %v239_v22, %v214_v23  ;;  %v267_v55 = vsel %vm266_vm10, %v214_v23, 0.0 }
 0x1e8   :  { %222 = vmax.xlane.f32.xlu1 %v221_v25 }
 0x1e9   :  { %v242_v27 = vsel %vm241_vm6, %v240_v26, -inf }
 0x1ea   :  { %243 = vmax.xlane.f32.xlu0 %v242_v27 }
 0x275   :  { %v223_v28 = vpop.xlane.xlu1 %222 }
 0x276   :  { %v224_v29 = vsub.f32 %v221_v25, %v223_v28 }
 0x277   :  { %v244_v30 = vpop.xlane.xlu0 %243 }
 0x278   :  { %v225_v31 = vmul.f32 1.442695, %v224_v29  ;;  %vm245_vm7 = vcmp.ge.f32.partialorder %v240_v26, %v244_v30 }
 0x279   :  { %v246_v32 = vsel %vm245_vm7, %v545_v21, 6 }
 0x27a   :  { %341 = vpow2.f32 %v225_v31  ;;  %v247_v33 = vsel %vm241_vm6, %v246_v32, 2147483647 }
 0x27b   :  { %v249_v34 = vshra.s32 %v247_v33, 16  ;;  %v248_v37 = vand.u32 65535, %v247_v33 }
 0x27d   :  { %v251_v35 = vcvt.s32.f32 %v249_v34  ;;  %v250_v39 = vcvt.s32.f32 %v248_v37 }
 0x27f   :  { %252 = vmin.xlane.f32.xlu1 %v251_v35 }
 0x284   :  { %v342_v36 = vpop.eup %341 }
 0x285   :  { %227 = vadd.xlane.f32.xlu1 %v342_v36 }
 0x30c   :  { %v253_v38 = vpop.xlane.xlu1 %252 }
 0x30d   :  { %vm254_vm8 = vcmp.eq.f32.partialorder %v251_v35, %v253_v38  ;;  %v259_v49 = vcvt.f32.s32 %v253_v38 }
 0x30e   :  { %v255_v40 = vsel %vm254_vm8, %v250_v39, inf }
 0x30f   :  { %256 = vmin.xlane.f32.xlu1 %v255_v40  ;;  %v260_v51 = vshll.u32 %v259_v49, 16 }
 0x312   :  { %v228_v41 = vpop.xlane.xlu1 %227 }
 0x313   :  { %343 = vlog2.f32 %v228_v41 }
 0x314   :  { %345 = vrcp.f32 %v228_v41 }
 0x31d   :  { %v344_v42 = vpop.eup %343 }
 0x31e   :  { %v346_v43 = vpop.eup %345  ;;  %v230_v44 = vmul.f32 0.6931472, %v344_v42 }
 0x31f   :  { %v232_v45 = vmul.f32 %v346_v43, %v342_v36 }
 0x320   :  { %v233_v46 = vsub.f32 %v224_v29, %v230_v44 }
 0x322   :  { %v234_v47 = vmul.f32 %v233_v46, %v232_v45 }
 0x324   :  { %v235_v48 = vsel %vm220_vm5, %v234_v47, 0.0 }
 0x325   :  { %236 = vadd.xlane.f32.xlu1 %v235_v48 }
 0x39c   :  { %v257_v50 = vpop.xlane.xlu1 %256 }
 0x39d   :  { %v258_v52 = vcvt.f32.s32 %v257_v50 }
 0x39f   :  { %v261_v53 = vadd.s32 %v260_v51, %v258_v52 }
 0x3a1   :  { %vm262_vm9 = vcmp.eq.s32.totalorder %v545_v21, %v261_v53  ;;  %v270_v57 = vcvt.s32.f32 %v261_v53 }
 0x3a2   :  { %v263_v54 = vsel %vm262_vm9, %v233_v46, 0.0 }
 0x3a3   :  { %264 = vadd.xlane.f32.xlu1 %v263_v54  ;;  %v272_v60 = vsel %vm271_vm11, %v270_v57, 0.0 }
 0x3a7   :  { %268 = vadd.xlane.f32.xlu1 %v267_v55 }
 0x3b2   :  { %v237_v56 = vpop.xlane.xlu1 %236 }
 0x3b3   :  { %v238_v58 = vsub.f32 0.0, %v237_v56 }
 0x3b5   :  { %v277_v63 = vsel %vm276_vm13, %v238_v58, 0.0 }
 0x430   :  { %v265_v59 = vpop.xlane.xlu1 %264 }
 0x431   :  { %v274_v61 = vsel %vm273_vm12, %v265_v59, 0.0 }
 0x432   :  { %v275_v62 = vadd.f32 %v274_v61, %v272_v60 }
 0x434   :  { %v278_v0 = vadd.f32 %v277_v63, %v275_v62  ;;  %v269_v1 = vpop.xlane.xlu1 %268 }
 0x435   :  { %v280_v2 = vsel %vm279_vm14, %v269_v1, 0.0 }
 0x436   :  { %v281_v3 = vadd.f32 %v280_v2, %v278_v0 }
 0x438   :  { %282 = vst [vmem:[#allocation8] sm:$0xff] %v281_v3 }
 0x439   :  { %424 = shalt.err (!%p421_p0)
}
 0x43a   :  { %s425_s3 = scalar_lea.hbm %s578_s7, 128 }
 0x43b   :  { %p426_p1 = scmp.ne.s32.totalorder %s578_s7, %s425_s3  ;;  %p429_p2 = scmp.lt.u32.totalorder %s425_s3, %s578_s7 }
 0x43d   :  { %p431_p3 = pnand %p429_p2, %p426_p1 }
 0x43f   :  { %434 = shalt.err (!%p431_p3)
}
 0x440   :  { %292 = dma.vmem_to_hbm [thread:$0]  %s290_s4, 128, %s578_s7, [#allocation4]  }
 0x441   :  { %439 = dma.done.wait [#allocation4], 128  }
 0x442   :  { %440 = vsyncadd [#allocation4], 4294967168 }
 0x443   :  { %296 = vsyncpa [#allocation3], 1 }
 0x444   :  { %297 = vsyncpa [#allocation6], 1 }
 0x445   :  { %298 = vsyncpa [#allocation4], 1 }

</bundles_post_ra>
